<compile_context>
chip_gen: v6e
topology: v6e:2x2x1
jax: 0.10.0
libtpu: 0.0.40
codegen_flags: <defaults>
</compile_context>

<pallas_src>
import functools

import jax
import jax.numpy as jnp
from jax import lax
from jax.experimental import pallas as pl
from jax.experimental.pallas import tpu as pltpu


def _round_up(x, m):
    return (x + m - 1) // m * m


def _pad_to(x, shape):
    return jnp.pad(x, [(0, t - s) for s, t in zip(x.shape, shape)])


def _layernorm_padded(x, g, b, d_true, eps=1e-5):
    """LayerNorm over the last axis when x is zero-padded beyond d_true.

    Padded columns of x, g, b are zero, so sum(x) and sum(x*x) are exact and the
    padded output columns come out as exactly zero.
    """
    inv_d = 1.0 / d_true
    mu = jnp.sum(x, axis=-1, keepdims=True) * inv_d
    var = jnp.sum(x * x, axis=-1, keepdims=True) * inv_d - mu * mu
    return (x - mu) * lax.rsqrt(var + eps) * g + b


def decoder_block_kernel(e_ref, wq_ref, wk_ref, wv_ref, wo_ref,
                         g1_ref, be1_ref, g2_ref, be2_ref,
                         w1_ref, b1_ref, w2_ref, b2_ref,
                         out_ref, *, num_heads, d_true, dq_pad):
    E = e_ref[0].astype(jnp.float32)                       # (S, Dp), zero-padded lanes

    # ---- residual connection 1: E + SelfAttention(LayerNorm(E)) ----
    n1 = _layernorm_padded(E, g1_ref[...], be1_ref[...], d_true)
    n1_bf = n1.astype(jnp.bfloat16)

    # H_Q pre-fused into each projection on host (PyTorch bug reproduced: H_Q applied
    # to Q, K and V); softmax scale & 1/temperature already folded into wq_ref.
    HQ = jnp.dot(n1_bf, wq_ref[...], preferred_element_type=jnp.float32)   # (S, H*dqp)
    HK = jnp.dot(n1_bf, wk_ref[...], preferred_element_type=jnp.float32)
    HV = jnp.dot(n1_bf, wv_ref[...], preferred_element_type=jnp.float32)

    # Small static head loop (num_heads is tiny here); head slices are 128-lane-aligned.
    # TODO(synk): at large num_heads switch to a heads-batched einsum / fori_loop to
    #             bound vreg live ranges.
    head_outs = []
    for h in range(num_heads):
        sl = slice(h * dq_pad, (h + 1) * dq_pad)
        qh = HQ[:, sl].astype(jnp.bfloat16)                # (S, dqp)
        kh = HK[:, sl].astype(jnp.bfloat16)
        vh = HV[:, sl].astype(jnp.bfloat16)
        # scores = qh @ kh^T (scale/temperature baked into the fused W_Q weight)
        scores = lax.dot_general(qh, kh, (((1,), (1,)), ((), ())),
                                 preferred_element_type=jnp.float32)       # (S, S)
        scores = scores - jnp.max(scores, axis=-1, keepdims=True)
        p = jnp.exp(scores)
        w = p * pl.reciprocal(jnp.sum(p, axis=-1, keepdims=True), approx=True)
        head_outs.append(jnp.dot(w.astype(jnp.bfloat16), vh,
                                 preferred_element_type=jnp.float32))      # (S, dqp)

    heads = jnp.concatenate(head_outs, axis=-1)            # (S, H*dqp)
    att = jnp.dot(heads.astype(jnp.bfloat16), wo_ref[...],
                  preferred_element_type=jnp.float32)      # (S, Dp)

    x1 = E + att

    # ---- residual connection 2: x1 + MLP(LayerNorm(x1)) ----
    n2 = _layernorm_padded(x1, g2_ref[...], be2_ref[...], d_true)
    h1 = jnp.dot(n2.astype(jnp.bfloat16), w1_ref[...],
                 preferred_element_type=jnp.float32) + b1_ref[...]
    h1 = jnp.maximum(h1, 0.0)
    mlp = jnp.dot(h1.astype(jnp.bfloat16), w2_ref[...],
                  preferred_element_type=jnp.float32) + b2_ref[...]

    out_ref[0] = (x1 + mlp).astype(out_ref.dtype)


def decoder_block(E, params, *, num_heads, temperature=1.0):
    B, S, D = E.shape
    d_mlp = params["w1"].shape[1]
    dq = D // num_heads

    LANE = 128
    Dp = _round_up(D, LANE)                  # padded model dim
    dqp = _round_up(dq, LANE)                # padded per-head dim
    Hdqp = num_heads * dqp                   # padded "heads" space
    Mp = _round_up(d_mlp, LANE)              # padded MLP hidden dim

    # ---- host-side weight fusion & lane padding (amortized across all calls) ----
    scale = 1.0 / (dq ** 0.5) / temperature
    wq_f = (params["wq"] @ params["hq"]) * scale           # fold scale/temp into W_Q
    wk_f = params["wk"] @ params["hq"]
    wv_f = params["wv"] @ params["hq"]

    def pad_heads_out(w):                    # (D, D) -> (Dp, Hdqp), per-head col blocks
        out = jnp.zeros((Dp, Hdqp), w.dtype)
        for h in range(num_heads):
            out = out.at[:D, h * dqp:h * dqp + dq].set(w[:, h * dq:(h + 1) * dq])
        return out

    def pad_heads_in(w):                     # (D, D) -> (Hdqp, Dp), per-head row blocks
        out = jnp.zeros((Hdqp, Dp), w.dtype)
        for h in range(num_heads):
            out = out.at[h * dqp:h * dqp + dq, :D].set(w[h * dq:(h + 1) * dq, :])
        return out

    wq_p = pad_heads_out(wq_f).astype(jnp.bfloat16)
    wk_p = pad_heads_out(wk_f).astype(jnp.bfloat16)
    wv_p = pad_heads_out(wv_f).astype(jnp.bfloat16)
    wo_p = pad_heads_in(params["wo"]).astype(jnp.bfloat16)

    w1_p = _pad_to(params["w1"], (Dp, Mp)).astype(jnp.bfloat16)
    w2_p = _pad_to(params["w2"], (Mp, Dp)).astype(jnp.bfloat16)
    b1_p = _pad_to(params["b1"], (1, Mp)).astype(jnp.float32)
    b2_p = _pad_to(params["b2"], (1, Dp)).astype(jnp.float32)
    g1_p = _pad_to(params["g1"], (1, Dp)).astype(jnp.float32)
    be1_p = _pad_to(params["be1"], (1, Dp)).astype(jnp.float32)
    g2_p = _pad_to(params["g2"], (1, Dp)).astype(jnp.float32)
    be2_p = _pad_to(params["be2"], (1, Dp)).astype(jnp.float32)

    E_p = _pad_to(E, (B, S, Dp))             # pad only the lane (feature) axis

    kern = functools.partial(decoder_block_kernel,
                             num_heads=num_heads, d_true=float(D), dq_pad=dqp)

    def full(shape):
        return pl.BlockSpec(shape, lambda b: tuple(0 for _ in shape))

    in_specs = [
        pl.BlockSpec((1, S, Dp), lambda b: (b, 0, 0)),     # E (padded)
        full((Dp, Hdqp)), full((Dp, Hdqp)), full((Dp, Hdqp)),   # fused W_Q/K/V
        full((Hdqp, Dp)),                                   # W_O
        full((1, Dp)), full((1, Dp)), full((1, Dp)), full((1, Dp)),  # ln1/ln2 g, b
        full((Dp, Mp)), full((1, Mp)),                      # MLP W1, b1
        full((Mp, Dp)), full((1, Dp)),                      # MLP W2, b2
    ]

    weights = (wq_p, wk_p, wv_p, wo_p, g1_p, be1_p, g2_p, be2_p, w1_p, b1_p, w2_p, b2_p)

    flops = 2 * B * S * (3 * Dp * Hdqp                      # fused QKV projections
                         + num_heads * S * dqp * 2          # scores + weighted values
                         + Hdqp * Dp                        # W_O
                         + Dp * Mp + Mp * Dp)               # MLP
    transcendentals = B * (num_heads * S * (S + 1) + 4 * S)  # exp + recip + 2x rsqrt
    weight_bytes = sum(int(a.size) * a.dtype.itemsize for a in weights)
    bytes_accessed = 2 * B * S * Dp * 4 + weight_bytes
    cost = pl.CostEstimate(flops=int(flops), transcendentals=int(transcendentals),
                           bytes_accessed=int(bytes_accessed))

    out_p = pl.pallas_call(
        kern,
        out_shape=jax.ShapeDtypeStruct((B, S, Dp), E.dtype),
        grid_spec=pltpu.PrefetchScalarGridSpec(
            num_scalar_prefetch=0,
            grid=(B,),
            in_specs=in_specs,
            out_specs=pl.BlockSpec((1, S, Dp), lambda b: (b, 0, 0)),
        ),
        compiler_params=pltpu.CompilerParams(dimension_semantics=("parallel",)),
        cost_estimate=cost,
    )(E_p, wq_p, wk_p, wv_p, wo_p, g1_p, be1_p, g2_p, be2_p, w1_p, b1_p, w2_p, b2_p)

    return out_p[:, :, :D]


def decoder_block_ref(E, params, *, num_heads, temperature=1.0):
    """Plain-JAX f32 reference with identical semantics (for validation)."""
    def ln(x, g, b):
        mu = x.mean(-1, keepdims=True)
        var = ((x - mu) ** 2).mean(-1, keepdims=True)
        return (x - mu) / jnp.sqrt(var + 1e-5) * g + b

    B, S, D = E.shape
    dq = D // num_heads
    n1 = ln(E, params["g1"][0], params["be1"][0])
    Q, K, V = n1 @ params["wq"], n1 @ params["wk"], n1 @ params["wv"]
    HQ, HK, HV = Q @ params["hq"], K @ params["hq"], V @ params["hq"]
    HQ = HQ.reshape(B, S, num_heads, dq).transpose(0, 2, 1, 3)
    HK = HK.reshape(B, S, num_heads, dq).transpose(0, 2, 1, 3)
    HV = HV.reshape(B, S, num_heads, dq).transpose(0, 2, 1, 3)
    sc = jnp.einsum('bhqd,bhkd->bhqk', HQ, HK) / (dq ** 0.5) / temperature
    w = jax.nn.softmax(sc, axis=-1)
    ho = jnp.einsum('bhqk,bhkd->bhqd', w, HV).transpose(0, 2, 1, 3).reshape(B, S, D)
    x1 = E + ho @ params["wo"]
    n2 = ln(x1, params["g2"][0], params["be2"][0])
    h1 = jnp.maximum(n2 @ params["w1"] + params["b1"][0], 0.0)
    return x1 + h1 @ params["w2"] + params["b2"][0]


if __name__ == "__main__":
    B, S, D = 2, 8, 10          # d_model = 10 (from the module)
    D_MLP = 24                  # d_mlp = 24 (from the module)
    NUM_HEADS = 2               # d_model % num_heads == 0
    TEMP = 1.0

    key = jax.random.PRNGKey(0)
    ks = jax.random.split(key, 12)
    init = lambda k, shp: (0.1 * jax.random.normal(k, shp)).astype(jnp.float32)

    params = {
        "wq": init(ks[0], (D, D)), "wk": init(ks[1], (D, D)), "wv": init(ks[2], (D, D)),
        "hq": init(ks[3], (D, D)), "wo": init(ks[4], (D, D)),
        "g1": jnp.ones((1, D), jnp.float32), "be1": jnp.zeros((1, D), jnp.float32),
        "g2": jnp.ones((1, D), jnp.float32), "be2": jnp.zeros((1, D), jnp.float32),
        "w1": init(ks[5], (D, D_MLP)), "b1": init(ks[6], (1, D_MLP)),
        "w2": init(ks[7], (D_MLP, D)), "b2": init(ks[8], (1, D)),
    }
    E = jax.random.normal(ks[9], (B, S, D), jnp.float32)

    out = decoder_block(E, params, num_heads=NUM_HEADS, temperature=TEMP)
    out = jax.block_until_ready(out)

    ref = decoder_block_ref(E, params, num_heads=NUM_HEADS, temperature=TEMP)
    assert out.shape == (B, S, D)
    # bf16 MXU operands + approx reciprocal -> slightly looser tolerance than pure-f32.
    assert jnp.allclose(out, ref, atol=2e-2, rtol=2e-2), "mismatch vs reference"
    print("KERNEL_OK")
</pallas_src>

<mosaic_0001>
module attributes {stable_mosaic.version = 11 : i64} {
  func.func @decoder_block_kernel(%arg0: i32, %arg1: memref<1x8x128xf32, #tpu.memory_space<vmem>>, %arg2: memref<128x256xbf16, #tpu.memory_space<vmem>>, %arg3: memref<128x256xbf16, #tpu.memory_space<vmem>>, %arg4: memref<128x256xbf16, #tpu.memory_space<vmem>>, %arg5: memref<256x128xbf16, #tpu.memory_space<vmem>>, %arg6: memref<1x128xf32, #tpu.memory_space<vmem>>, %arg7: memref<1x128xf32, #tpu.memory_space<vmem>>, %arg8: memref<1x128xf32, #tpu.memory_space<vmem>>, %arg9: memref<1x128xf32, #tpu.memory_space<vmem>>, %arg10: memref<128x128xbf16, #tpu.memory_space<vmem>>, %arg11: memref<1x128xf32, #tpu.memory_space<vmem>>, %arg12: memref<128x128xbf16, #tpu.memory_space<vmem>>, %arg13: memref<1x128xf32, #tpu.memory_space<vmem>>, %arg14: memref<1x8x128xf32, #tpu.memory_space<vmem>>) attributes {dimension_semantics = [#tpu.dimension_semantics<parallel>], iteration_bounds = array<i64: 2>, scalar_prefetch = 0 : i64, scratch_operands = 0 : i64, tpu.core_type = #tpu.core_type<tc>, window_params = [{transform_indices = @transform_0, window_bounds = array<i64: 1, 8, 128>}, {pipeline_mode = #tpu.pipeline_mode<synchronous>, transform_indices = @transform_1, window_bounds = array<i64: 128, 256>}, {pipeline_mode = #tpu.pipeline_mode<synchronous>, transform_indices = @transform_2, window_bounds = array<i64: 128, 256>}, {pipeline_mode = #tpu.pipeline_mode<synchronous>, transform_indices = @transform_3, window_bounds = array<i64: 128, 256>}, {pipeline_mode = #tpu.pipeline_mode<synchronous>, transform_indices = @transform_4, window_bounds = array<i64: 256, 128>}, {pipeline_mode = #tpu.pipeline_mode<synchronous>, transform_indices = @transform_5, window_bounds = array<i64: 1, 128>}, {pipeline_mode = #tpu.pipeline_mode<synchronous>, transform_indices = @transform_6, window_bounds = array<i64: 1, 128>}, {pipeline_mode = #tpu.pipeline_mode<synchronous>, transform_indices = @transform_7, window_bounds = array<i64: 1, 128>}, {pipeline_mode = #tpu.pipeline_mode<synchronous>, transform_indices = @transform_8, window_bounds = array<i64: 1, 128>}, {pipeline_mode = #tpu.pipeline_mode<synchronous>, transform_indices = @transform_9, window_bounds = array<i64: 128, 128>}, {pipeline_mode = #tpu.pipeline_mode<synchronous>, transform_indices = @transform_10, window_bounds = array<i64: 1, 128>}, {pipeline_mode = #tpu.pipeline_mode<synchronous>, transform_indices = @transform_11, window_bounds = array<i64: 128, 128>}, {pipeline_mode = #tpu.pipeline_mode<synchronous>, transform_indices = @transform_12, window_bounds = array<i64: 1, 128>}, {transform_indices = @transform_13, window_bounds = array<i64: 1, 8, 128>}]} {
    %c0 = arith.constant 0 : index
    %c0_0 = arith.constant 0 : index
    %c0_1 = arith.constant 0 : index
    %0 = vector.load %arg1[%c0, %c0_0, %c0_1] : memref<1x8x128xf32, #tpu.memory_space<vmem>>, vector<1x8x128xf32>
    %1 = vector.shape_cast %0 : vector<1x8x128xf32> to vector<8x128xf32>
    %c0_2 = arith.constant 0 : index
    %c0_3 = arith.constant 0 : index
    %2 = vector.load %arg6[%c0_2, %c0_3] : memref<1x128xf32, #tpu.memory_space<vmem>>, vector<1x128xf32>
    %c0_4 = arith.constant 0 : index
    %c0_5 = arith.constant 0 : index
    %3 = vector.load %arg7[%c0_4, %c0_5] : memref<1x128xf32, #tpu.memory_space<vmem>>, vector<1x128xf32>
    %cst = arith.constant dense<0.000000e+00> : vector<8xf32>
    %4 = vector.multi_reduction <add>, %1, %cst [1] : vector<8x128xf32> to vector<8xf32>
    %5 = vector.shape_cast %4 : vector<8xf32> to vector<8x1xf32>
    %cst_6 = arith.constant 1.000000e-01 : f32
    %6 = vector.broadcast %cst_6 : f32 to vector<8x1xf32>
    %7 = arith.mulf %5, %6 : vector<8x1xf32>
    %8 = arith.mulf %1, %1 : vector<8x128xf32>
    %cst_7 = arith.constant dense<0.000000e+00> : vector<8xf32>
    %9 = vector.multi_reduction <add>, %8, %cst_7 [1] : vector<8x128xf32> to vector<8xf32>
    %10 = vector.shape_cast %9 : vector<8xf32> to vector<8x1xf32>
    %cst_8 = arith.constant 1.000000e-01 : f32
    %11 = vector.broadcast %cst_8 : f32 to vector<8x1xf32>
    %12 = arith.mulf %10, %11 : vector<8x1xf32>
    %13 = arith.mulf %7, %7 : vector<8x1xf32>
    %14 = arith.subf %12, %13 : vector<8x1xf32>
    %15 = vector.broadcast %7 : vector<8x1xf32> to vector<8x128xf32>
    %16 = arith.subf %1, %15 : vector<8x128xf32>
    %cst_9 = arith.constant 9.99999974E-6 : f32
    %17 = vector.broadcast %cst_9 : f32 to vector<8x1xf32>
    %18 = arith.addf %14, %17 : vector<8x1xf32>
    %19 = math.rsqrt %18 : vector<8x1xf32>
    %20 = vector.broadcast %19 : vector<8x1xf32> to vector<8x128xf32>
    %21 = arith.mulf %16, %20 : vector<8x128xf32>
    %22 = vector.broadcast %2 : vector<1x128xf32> to vector<8x128xf32>
    %23 = arith.mulf %21, %22 : vector<8x128xf32>
    %24 = vector.broadcast %3 : vector<1x128xf32> to vector<8x128xf32>
    %25 = arith.addf %23, %24 : vector<8x128xf32>
    %26 = arith.truncf %25 : vector<8x128xf32> to vector<8x128xbf16>
    %c0_10 = arith.constant 0 : index
    %c0_11 = arith.constant 0 : index
    %27 = vector.load %arg2[%c0_10, %c0_11] : memref<128x256xbf16, #tpu.memory_space<vmem>>, vector<128x256xbf16>
    %cst_12 = arith.constant dense<0.000000e+00> : vector<8x256xf32>
    %28 = tpu.matmul %26, %27, %cst_12 {dimension_numbers = #tpu.dot_dimension_numbers<[1], [0], [0], [1], [0, 0, 1, 1], [], []>} : vector<8x128xbf16>, vector<128x256xbf16>, vector<8x256xf32> -> vector<8x256xf32>
    %c0_13 = arith.constant 0 : index
    %c0_14 = arith.constant 0 : index
    %29 = vector.load %arg3[%c0_13, %c0_14] : memref<128x256xbf16, #tpu.memory_space<vmem>>, vector<128x256xbf16>
    %cst_15 = arith.constant dense<0.000000e+00> : vector<8x256xf32>
    %30 = tpu.matmul %26, %29, %cst_15 {dimension_numbers = #tpu.dot_dimension_numbers<[1], [0], [0], [1], [0, 0, 1, 1], [], []>} : vector<8x128xbf16>, vector<128x256xbf16>, vector<8x256xf32> -> vector<8x256xf32>
    %c0_16 = arith.constant 0 : index
    %c0_17 = arith.constant 0 : index
    %31 = vector.load %arg4[%c0_16, %c0_17] : memref<128x256xbf16, #tpu.memory_space<vmem>>, vector<128x256xbf16>
    %cst_18 = arith.constant dense<0.000000e+00> : vector<8x256xf32>
    %32 = tpu.matmul %26, %31, %cst_18 {dimension_numbers = #tpu.dot_dimension_numbers<[1], [0], [0], [1], [0, 0, 1, 1], [], []>} : vector<8x128xbf16>, vector<128x256xbf16>, vector<8x256xf32> -> vector<8x256xf32>
    %33 = vector.extract_strided_slice %28 {offsets = [0, 0], sizes = [8, 128], strides = [1, 1]} : vector<8x256xf32> to vector<8x128xf32>
    %34 = arith.truncf %33 : vector<8x128xf32> to vector<8x128xbf16>
    %35 = vector.extract_strided_slice %30 {offsets = [0, 0], sizes = [8, 128], strides = [1, 1]} : vector<8x256xf32> to vector<8x128xf32>
    %36 = arith.truncf %35 : vector<8x128xf32> to vector<8x128xbf16>
    %37 = vector.extract_strided_slice %32 {offsets = [0, 0], sizes = [8, 128], strides = [1, 1]} : vector<8x256xf32> to vector<8x128xf32>
    %38 = arith.truncf %37 : vector<8x128xf32> to vector<8x128xbf16>
    %cst_19 = arith.constant dense<0.000000e+00> : vector<8x8xf32>
    %39 = tpu.matmul %34, %36, %cst_19 {dimension_numbers = #tpu.dot_dimension_numbers<[1], [1], [0], [0], [0, 0, 1, 0], [], []>} : vector<8x128xbf16>, vector<8x128xbf16>, vector<8x8xf32> -> vector<8x8xf32>
    %cst_20 = arith.constant dense<0xFF800000> : vector<8xf32>
    %40 = vector.multi_reduction <maximumf>, %39, %cst_20 [1] : vector<8x8xf32> to vector<8xf32>
    %41 = vector.shape_cast %40 : vector<8xf32> to vector<8x1xf32>
    %42 = vector.broadcast %41 : vector<8x1xf32> to vector<8x8xf32>
    %43 = arith.subf %39, %42 : vector<8x8xf32>
    %44 = math.exp %43 : vector<8x8xf32>
    %cst_21 = arith.constant dense<0.000000e+00> : vector<8xf32>
    %45 = vector.multi_reduction <add>, %44, %cst_21 [1] : vector<8x8xf32> to vector<8xf32>
    %46 = vector.shape_cast %45 : vector<8xf32> to vector<8x1xf32>
    %47 = tpu.reciprocal %46 {approx = true} : vector<8x1xf32> -> vector<8x1xf32>
    %48 = vector.broadcast %47 : vector<8x1xf32> to vector<8x8xf32>
    %49 = arith.mulf %44, %48 : vector<8x8xf32>
    %50 = arith.truncf %49 : vector<8x8xf32> to vector<8x8xbf16>
    %cst_22 = arith.constant dense<0.000000e+00> : vector<8x128xf32>
    %51 = tpu.matmul %50, %38, %cst_22 {dimension_numbers = #tpu.dot_dimension_numbers<[1], [0], [0], [1], [0, 0, 1, 1], [], []>} : vector<8x8xbf16>, vector<8x128xbf16>, vector<8x128xf32> -> vector<8x128xf32>
    %52 = vector.extract_strided_slice %28 {offsets = [0, 128], sizes = [8, 128], strides = [1, 1]} : vector<8x256xf32> to vector<8x128xf32>
    %53 = arith.truncf %52 : vector<8x128xf32> to vector<8x128xbf16>
    %54 = vector.extract_strided_slice %30 {offsets = [0, 128], sizes = [8, 128], strides = [1, 1]} : vector<8x256xf32> to vector<8x128xf32>
    %55 = arith.truncf %54 : vector<8x128xf32> to vector<8x128xbf16>
    %56 = vector.extract_strided_slice %32 {offsets = [0, 128], sizes = [8, 128], strides = [1, 1]} : vector<8x256xf32> to vector<8x128xf32>
    %57 = arith.truncf %56 : vector<8x128xf32> to vector<8x128xbf16>
    %cst_23 = arith.constant dense<0.000000e+00> : vector<8x8xf32>
    %58 = tpu.matmul %53, %55, %cst_23 {dimension_numbers = #tpu.dot_dimension_numbers<[1], [1], [0], [0], [0, 0, 1, 0], [], []>} : vector<8x128xbf16>, vector<8x128xbf16>, vector<8x8xf32> -> vector<8x8xf32>
    %cst_24 = arith.constant dense<0xFF800000> : vector<8xf32>
    %59 = vector.multi_reduction <maximumf>, %58, %cst_24 [1] : vector<8x8xf32> to vector<8xf32>
    %60 = vector.shape_cast %59 : vector<8xf32> to vector<8x1xf32>
    %61 = vector.broadcast %60 : vector<8x1xf32> to vector<8x8xf32>
    %62 = arith.subf %58, %61 : vector<8x8xf32>
    %63 = math.exp %62 : vector<8x8xf32>
    %cst_25 = arith.constant dense<0.000000e+00> : vector<8xf32>
    %64 = vector.multi_reduction <add>, %63, %cst_25 [1] : vector<8x8xf32> to vector<8xf32>
    %65 = vector.shape_cast %64 : vector<8xf32> to vector<8x1xf32>
    %66 = tpu.reciprocal %65 {approx = true} : vector<8x1xf32> -> vector<8x1xf32>
    %67 = vector.broadcast %66 : vector<8x1xf32> to vector<8x8xf32>
    %68 = arith.mulf %63, %67 : vector<8x8xf32>
    %69 = arith.truncf %68 : vector<8x8xf32> to vector<8x8xbf16>
    %cst_26 = arith.constant dense<0.000000e+00> : vector<8x128xf32>
    %70 = tpu.matmul %69, %57, %cst_26 {dimension_numbers = #tpu.dot_dimension_numbers<[1], [0], [0], [1], [0, 0, 1, 1], [], []>} : vector<8x8xbf16>, vector<8x128xbf16>, vector<8x128xf32> -> vector<8x128xf32>
    %71 = tpu.concatenate %51, %70 in 1 : vector<8x128xf32>, vector<8x128xf32> -> vector<8x256xf32>
    %72 = arith.truncf %71 : vector<8x256xf32> to vector<8x256xbf16>
    %c0_27 = arith.constant 0 : index
    %c0_28 = arith.constant 0 : index
    %73 = vector.load %arg5[%c0_27, %c0_28] : memref<256x128xbf16, #tpu.memory_space<vmem>>, vector<256x128xbf16>
    %cst_29 = arith.constant dense<0.000000e+00> : vector<8x128xf32>
    %74 = tpu.matmul %72, %73, %cst_29 {dimension_numbers = #tpu.dot_dimension_numbers<[1], [0], [0], [1], [0, 0, 1, 1], [], []>} : vector<8x256xbf16>, vector<256x128xbf16>, vector<8x128xf32> -> vector<8x128xf32>
    %75 = arith.addf %1, %74 : vector<8x128xf32>
    %c0_30 = arith.constant 0 : index
    %c0_31 = arith.constant 0 : index
    %76 = vector.load %arg8[%c0_30, %c0_31] : memref<1x128xf32, #tpu.memory_space<vmem>>, vector<1x128xf32>
    %c0_32 = arith.constant 0 : index
    %c0_33 = arith.constant 0 : index
    %77 = vector.load %arg9[%c0_32, %c0_33] : memref<1x128xf32, #tpu.memory_space<vmem>>, vector<1x128xf32>
    %cst_34 = arith.constant dense<0.000000e+00> : vector<8xf32>
    %78 = vector.multi_reduction <add>, %75, %cst_34 [1] : vector<8x128xf32> to vector<8xf32>
    %79 = vector.shape_cast %78 : vector<8xf32> to vector<8x1xf32>
    %cst_35 = arith.constant 1.000000e-01 : f32
    %80 = vector.broadcast %cst_35 : f32 to vector<8x1xf32>
    %81 = arith.mulf %79, %80 : vector<8x1xf32>
    %82 = arith.mulf %75, %75 : vector<8x128xf32>
    %cst_36 = arith.constant dense<0.000000e+00> : vector<8xf32>
    %83 = vector.multi_reduction <add>, %82, %cst_36 [1] : vector<8x128xf32> to vector<8xf32>
    %84 = vector.shape_cast %83 : vector<8xf32> to vector<8x1xf32>
    %cst_37 = arith.constant 1.000000e-01 : f32
    %85 = vector.broadcast %cst_37 : f32 to vector<8x1xf32>
    %86 = arith.mulf %84, %85 : vector<8x1xf32>
    %87 = arith.mulf %81, %81 : vector<8x1xf32>
    %88 = arith.subf %86, %87 : vector<8x1xf32>
    %89 = vector.broadcast %81 : vector<8x1xf32> to vector<8x128xf32>
    %90 = arith.subf %75, %89 : vector<8x128xf32>
    %cst_38 = arith.constant 9.99999974E-6 : f32
    %91 = vector.broadcast %cst_38 : f32 to vector<8x1xf32>
    %92 = arith.addf %88, %91 : vector<8x1xf32>
    %93 = math.rsqrt %92 : vector<8x1xf32>
    %94 = vector.broadcast %93 : vector<8x1xf32> to vector<8x128xf32>
    %95 = arith.mulf %90, %94 : vector<8x128xf32>
    %96 = vector.broadcast %76 : vector<1x128xf32> to vector<8x128xf32>
    %97 = arith.mulf %95, %96 : vector<8x128xf32>
    %98 = vector.broadcast %77 : vector<1x128xf32> to vector<8x128xf32>
    %99 = arith.addf %97, %98 : vector<8x128xf32>
    %100 = arith.truncf %99 : vector<8x128xf32> to vector<8x128xbf16>
    %c0_39 = arith.constant 0 : index
    %c0_40 = arith.constant 0 : index
    %101 = vector.load %arg10[%c0_39, %c0_40] : memref<128x128xbf16, #tpu.memory_space<vmem>>, vector<128x128xbf16>
    %cst_41 = arith.constant dense<0.000000e+00> : vector<8x128xf32>
    %102 = tpu.matmul %100, %101, %cst_41 {dimension_numbers = #tpu.dot_dimension_numbers<[1], [0], [0], [1], [0, 0, 1, 1], [], []>} : vector<8x128xbf16>, vector<128x128xbf16>, vector<8x128xf32> -> vector<8x128xf32>
    %c0_42 = arith.constant 0 : index
    %c0_43 = arith.constant 0 : index
    %103 = vector.load %arg11[%c0_42, %c0_43] : memref<1x128xf32, #tpu.memory_space<vmem>>, vector<1x128xf32>
    %104 = vector.broadcast %103 : vector<1x128xf32> to vector<8x128xf32>
    %105 = arith.addf %102, %104 : vector<8x128xf32>
    %cst_44 = arith.constant 0.000000e+00 : f32
    %106 = vector.broadcast %cst_44 : f32 to vector<8x128xf32>
    %107 = arith.maximumf %105, %106 : vector<8x128xf32>
    %108 = arith.truncf %107 : vector<8x128xf32> to vector<8x128xbf16>
    %c0_45 = arith.constant 0 : index
    %c0_46 = arith.constant 0 : index
    %109 = vector.load %arg12[%c0_45, %c0_46] : memref<128x128xbf16, #tpu.memory_space<vmem>>, vector<128x128xbf16>
    %cst_47 = arith.constant dense<0.000000e+00> : vector<8x128xf32>
    %110 = tpu.matmul %108, %109, %cst_47 {dimension_numbers = #tpu.dot_dimension_numbers<[1], [0], [0], [1], [0, 0, 1, 1], [], []>} : vector<8x128xbf16>, vector<128x128xbf16>, vector<8x128xf32> -> vector<8x128xf32>
    %c0_48 = arith.constant 0 : index
    %c0_49 = arith.constant 0 : index
    %111 = vector.load %arg13[%c0_48, %c0_49] : memref<1x128xf32, #tpu.memory_space<vmem>>, vector<1x128xf32>
    %112 = vector.broadcast %111 : vector<1x128xf32> to vector<8x128xf32>
    %113 = arith.addf %110, %112 : vector<8x128xf32>
    %114 = arith.addf %75, %113 : vector<8x128xf32>
    %c0_50 = arith.constant 0 : index
    %c0_51 = arith.constant 0 : index
    %c0_52 = arith.constant 0 : index
    %115 = vector.load %arg14[%c0_50, %c0_51, %c0_52] : memref<1x8x128xf32, #tpu.memory_space<vmem>>, vector<1x8x128xf32>
    %116 = vector.shape_cast %115 : vector<1x8x128xf32> to vector<8x128xf32>
    %117 = vector.shape_cast %114 : vector<8x128xf32> to vector<1x8x128xf32>
    tpu.vector_store %arg14[%c0_50, %c0_51, %c0_52], %117 {strides = array<i32>} : memref<1x8x128xf32, #tpu.memory_space<vmem>>, vector<1x8x128xf32>,
    return
  }
  func.func @transform_0(%arg0: i32) -> (i32, i32, i32) {
    %c0_i32 = arith.constant 0 : i32
    %c0_i32_0 = arith.constant 0 : i32
    %c0_i32_1 = arith.constant 0 : i32
    return %arg0, %c0_i32, %c0_i32_0 : i32, i32, i32
  }
  func.func @transform_1(%arg0: i32) -> (i32, i32) {
    %c0_i32 = arith.constant 0 : i32
    %c0_i32_0 = arith.constant 0 : i32
    %c0_i32_1 = arith.constant 0 : i32
    return %c0_i32, %c0_i32_0 : i32, i32
  }
  func.func @transform_2(%arg0: i32) -> (i32, i32) {
    %c0_i32 = arith.constant 0 : i32
    %c0_i32_0 = arith.constant 0 : i32
    %c0_i32_1 = arith.constant 0 : i32
    return %c0_i32, %c0_i32_0 : i32, i32
  }
  func.func @transform_3(%arg0: i32) -> (i32, i32) {
    %c0_i32 = arith.constant 0 : i32
    %c0_i32_0 = arith.constant 0 : i32
    %c0_i32_1 = arith.constant 0 : i32
    return %c0_i32, %c0_i32_0 : i32, i32
  }
  func.func @transform_4(%arg0: i32) -> (i32, i32) {
    %c0_i32 = arith.constant 0 : i32
    %c0_i32_0 = arith.constant 0 : i32
    %c0_i32_1 = arith.constant 0 : i32
    return %c0_i32, %c0_i32_0 : i32, i32
  }
  func.func @transform_5(%arg0: i32) -> (i32, i32) {
    %c0_i32 = arith.constant 0 : i32
    %c0_i32_0 = arith.constant 0 : i32
    %c0_i32_1 = arith.constant 0 : i32
    return %c0_i32, %c0_i32_0 : i32, i32
  }
  func.func @transform_6(%arg0: i32) -> (i32, i32) {
    %c0_i32 = arith.constant 0 : i32
    %c0_i32_0 = arith.constant 0 : i32
    %c0_i32_1 = arith.constant 0 : i32
    return %c0_i32, %c0_i32_0 : i32, i32
  }
  func.func @transform_7(%arg0: i32) -> (i32, i32) {
    %c0_i32 = arith.constant 0 : i32
    %c0_i32_0 = arith.constant 0 : i32
    %c0_i32_1 = arith.constant 0 : i32
    return %c0_i32, %c0_i32_0 : i32, i32
  }
  func.func @transform_8(%arg0: i32) -> (i32, i32) {
    %c0_i32 = arith.constant 0 : i32
    %c0_i32_0 = arith.constant 0 : i32
    %c0_i32_1 = arith.constant 0 : i32
    return %c0_i32, %c0_i32_0 : i32, i32
  }
  func.func @transform_9(%arg0: i32) -> (i32, i32) {
    %c0_i32 = arith.constant 0 : i32
    %c0_i32_0 = arith.constant 0 : i32
    %c0_i32_1 = arith.constant 0 : i32
    return %c0_i32, %c0_i32_0 : i32, i32
  }
  func.func @transform_10(%arg0: i32) -> (i32, i32) {
    %c0_i32 = arith.constant 0 : i32
    %c0_i32_0 = arith.constant 0 : i32
    %c0_i32_1 = arith.constant 0 : i32
    return %c0_i32, %c0_i32_0 : i32, i32
  }
  func.func @transform_11(%arg0: i32) -> (i32, i32) {
    %c0_i32 = arith.constant 0 : i32
    %c0_i32_0 = arith.constant 0 : i32
    %c0_i32_1 = arith.constant 0 : i32
    return %c0_i32, %c0_i32_0 : i32, i32
  }
  func.func @transform_12(%arg0: i32) -> (i32, i32) {
    %c0_i32 = arith.constant 0 : i32
    %c0_i32_0 = arith.constant 0 : i32
    %c0_i32_1 = arith.constant 0 : i32
    return %c0_i32, %c0_i32_0 : i32, i32
  }
  func.func @transform_13(%arg0: i32) -> (i32, i32, i32) {
    %c0_i32 = arith.constant 0 : i32
    %c0_i32_0 = arith.constant 0 : i32
    %c0_i32_1 = arith.constant 0 : i32
    return %arg0, %c0_i32, %c0_i32_0 : i32, i32, i32
  }
}

</mosaic_0001>

<bundles_post_ra>
// kernel: tpu_custom_call.1
= control target key start
LH: loop header
LB: loop body
LE: loop exit
PB: predicated region body
PF: predicated region fallthrough
CT: control target
= control target key end

     0   :  { %s2874_s0 = inlined_call_operand.hbm [shape: f32[2,8,128], index: 0, kind: input, shape index: {}]   ;;  %s2875_s1 = inlined_call_operand.hbm [shape: bf16[128,256], index: 1, kind: input, shape index: {}]   ;;  %s2876_s2 = inlined_call_operand.hbm [shape: bf16[128,256], index: 2, kind: input, shape index: {}]   ;;  %s2877_s3 = inlined_call_operand.hbm [shape: bf16[128,256], index: 3, kind: input, shape index: {}]   ;;  %s2878_s4 = inlined_call_operand.hbm [shape: bf16[256,128], index: 4, kind: input, shape index: {}]   ;;  %s2879_s5 = inlined_call_operand.vmem [shape: f32[1,128], index: 5, kind: input, shape index: {}]   ;;  %s2880_s6 = inlined_call_operand.vmem [shape: f32[1,128], index: 6, kind: input, shape index: {}]   ;;  %s2881_s7 = inlined_call_operand.vmem [shape: f32[1,128], index: 7, kind: input, shape index: {}]   ;;  %s2882_s8 = inlined_call_operand.vmem [shape: f32[1,128], index: 8, kind: input, shape index: {}]   ;;  %s2883_s9 = inlined_call_operand.hbm [shape: bf16[128,128], index: 9, kind: input, shape index: {}]   ;;  %s2884_s10 = inlined_call_operand.vmem [shape: f32[1,128], index: 10, kind: input, shape index: {}]   ;;  %s2885_s11 = inlined_call_operand.hbm [shape: bf16[128,128], index: 11, kind: input, shape index: {}]   ;;  %s2886_s12 = inlined_call_operand.vmem [shape: f32[1,128], index: 12, kind: input, shape index: {}]   ;;  %s2887_s13 = inlined_call_operand.hbm [shape: f32[2,8,128], index: 13, kind: output, shape index: {}]  }
   0x1   :  { %2895 = sst [smem:[#allocation21_spill]] %s2875_s1 }
   0x2   :  { %2896 = sst [smem:[#allocation22_spill]] %s2876_s2 }
   0x3   :  { %2897 = sst [smem:[#allocation23_spill]] %s2877_s3 }
   0x4   :  { %2898 = sst [smem:[#allocation24_spill]] %s2878_s4 }
   0x5   :  { %2899 = sst [smem:[#allocation25_spill]] %s2883_s9 }
   0x6   :  { %2900 = sst [smem:[#allocation26_spill]] %s2885_s11 }
   0x7   :  { %2901 = sst [smem:[#allocation27_spill]] %s2887_s13 }
   0x8   :  { %18 = vsyncpa [#allocation3], 0 }
   0x9   :  { %20 = vsyncpa [#allocation3 + $0x1], 0 }
   0xa   :  { %21 = vsyncpa [#allocation6], 0 }
   0xb   :  { %22 = vsyncpa [#allocation9], 0 }
   0xc   :  { %23 = vsyncpa [#allocation12], 0 }
   0xd   :  { %24 = vsyncpa [#allocation4], 0 }
   0xe   :  { %26 = vsyncpa [#allocation4 + $0x1], 0  ;;  %s2559_s25 = smov 0   ;;  %s2561_s26 = smov 0  }
   0xf   :  { %s2563_s27 = smov 0   ;;  %s2565_s28 = smov 0  }
  0x10 LB: > { %s2474_s29 = smov [#allocation5]   ;;  %s2580_s14 = sadd.s32 4294967295, %s2472_s28   ;;  %s2472_s28 = sphi %s2565_s28, %s2935_s28   ;;  %s2468_s27 = sphi %s2563_s27, %s2934_s27   ;;  %s2464_s26 = sphi %s2561_s26, %s2933_s26   ;;  %s2460_s25 = sphi %s2559_s25, %s2932_s25  }
  0x11   : > { %s353_s30 = sshll.u32 %s2474_s29, 4  ;;  %p1759_p0 = scmp.ge.s32.totalorder %s2472_s28, 1  ;;  %s354_s30 = int_to_ptr.vmem [resolvable:$true] %s353_s30 }
  0x12   : > { %p2891_p1 = scmp.eq.s32.totalorder %s2580_s14, 0  ;;  %p341_p2 = scmp.lt.s32.totalorder %s2472_s28, 3 }
  0x13   : > { %s2475_s16 = smov [#allocation8]   ;;  %s2476_s19 = smov [#allocation11]  }
  0x14   : > { %p2585_p3 = pnand %p1759_p0, %p341_p2  ;;  %s379_s17 = sshll.u32 %s2475_s16, 4  ;;  %s380_s17 = int_to_ptr.vmem [resolvable:$true] %s379_s17 }
  0x15   : > { %s417_s20 = sshll.u32 %s2476_s19, 4  ;;  %s2223_s22 = scalar_lea.vmem %s354_s30, 2048  ;;  %s418_s20 = int_to_ptr.vmem [resolvable:$true] %s417_s20 }
  0x16   : > { %s2902_s15 = scalar_select %p2585_p3, 1, 0 }
  0x17   : > { %p2010_p5 = pneg %p2585_p3  ;;  %p2224_p8 = scmp.ne.s32.totalorder %s354_s30, %s2223_s22 }
  0x18   : > { %p2231_p11 = scmp.lt.s32.totalorder %s354_s30, %s354_s30  ;;  %p2232_p12 = scmp.lt.s32.totalorder %s2223_s22, %s2223_s22 }
  0x19   : > { %p2594_p6 = pnand %p2010_p5, %p2891_p1 }
  0x1a   : > { %p2233_p13 = por %p2232_p12, %p2231_p11 }
  0x1b   : > { %p2600_p7 = pneg %p2594_p6 }
  0x1d   : > { %p2226_p9 = pnand %p2224_p8, %p2600_p7 }
  0x1f   : > { %p2227_p10 = pneg %p2226_p9 }
  0x21   : > { %p2234_p0 = pnand %p2233_p13, %p2227_p10 }
  0x23   : > { %2237 = shalt.err (!%p2234_p0)
}
  0x24   : > { %s2889_s23 = smov 128   ;;  %s2890_s24 = smov 8  }
  0x25   : > { %s2905_s1 = sld [smem:[#allocation21_spill]]  ;;  %s2249_s19 = scalar_lea.vmem %s380_s17, 2048 }
  0x26   : > { %p2250_p2 = scmp.ne.s32.totalorder %s380_s17, %s2249_s19  ;;  %p2257_p9 = scmp.lt.s32.totalorder %s380_s17, %s380_s17 }
  0x27   : > { %p2258_p10 = scmp.lt.s32.totalorder %s2249_s19, %s2249_s19 }
  0x28   : > { %p2252_p5 = pnand %p2250_p2, %p2600_p7 }
  0x29   : > { %p2259_p11 = por %p2258_p10, %p2257_p9 }
  0x2a   : > { %p2253_p8 = pneg %p2252_p5 }
  0x2b   : > { %2013 = dma.hbm_to_vmem [thread:$0]  (!%p2594_p6), %s2905_s1, 2048, %s354_s30, [#allocation6], %s2889_s23, %s2889_s23, %s2890_s24  }
  0x2c   : > { %p2260_p12 = pnand %p2259_p11, %p2253_p8 }
  0x2e   : > { %2263 = shalt.err (!%p2260_p12)
}
  0x2f   : > { %s2906_s3 = sld [smem:[#allocation23_spill]]  ;;  %s2275_s30 = scalar_lea.vmem %s418_s20, 1024 }
  0x30   : > { %p2276_p13 = scmp.ne.s32.totalorder %s418_s20, %s2275_s30  ;;  %p2283_p5 = scmp.lt.s32.totalorder %s418_s20, %s418_s20 }
  0x31   : > { %p2284_p9 = scmp.lt.s32.totalorder %s2275_s30, %s2275_s30 }
  0x32   : > { %p2278_p0 = pnand %p2276_p13, %p2600_p7 }
  0x33   : > { %p2285_p8 = por %p2284_p9, %p2283_p5 }
  0x34   : > { %p2279_p2 = pneg %p2278_p0 }
  0x35   : > { %2019 = dma.hbm_to_vmem [thread:$0]  (!%p2594_p6), %s2906_s3, 2048, %s380_s17, [#allocation9], %s2889_s23, %s2889_s23, %s2890_s24  }
  0x36   : > { %p2286_p10 = pnand %p2285_p8, %p2279_p2 }
  0x38   : > { %2289 = shalt.err (!%p2286_p10)
}
  0x39   : > { %s2479_s29 = smov 64   ;;  %s2480_s16 = smov 4  }
  0x3a   : > { %s2907_s9 = sld [smem:[#allocation25_spill]]  ;;  %s2481_s19 = smov [#allocation7]  }
  0x3b   : > { %s366_s22 = sshll.u32 %s2481_s19, 4  ;;  %s2482_s23 = smov [#allocation10]   ;;  %s367_s22 = int_to_ptr.vmem [resolvable:$true] %s366_s22 }
  0x3c   : > { %s392_s30 = sshll.u32 %s2482_s23, 4  ;;  %s2301_s24 = scalar_lea.vmem %s367_s22, 2048  ;;  %s393_s30 = int_to_ptr.vmem [resolvable:$true] %s392_s30 }
  0x3d   : > { %p2302_p11 = scmp.ne.s32.totalorder %s367_s22, %s2301_s24  ;;  %p2309_p0 = scmp.lt.s32.totalorder %s367_s22, %s367_s22 }
  0x3e   : > { %p2310_p2 = scmp.lt.s32.totalorder %s2301_s24, %s2301_s24 }
  0x3f   : > { %p2304_p12 = pnand %p2302_p11, %p2600_p7 }
  0x40   : > { %2025 = dma.hbm_to_vmem [thread:$0]  (!%p2594_p6), %s2907_s9, 1024, %s418_s20, [#allocation12], %s2479_s29, %s2479_s29, %s2480_s16  }
  0x41   : > { %p2305_p13 = pneg %p2304_p12  ;;  %p2311_p5 = por %p2310_p2, %p2309_p0 }
  0x43   : > { %p2312_p9 = pnand %p2311_p5, %p2305_p13 }
  0x45   : > { %2315 = shalt.err (!%p2312_p9)
}
  0x46   : > { %s2908_s1 = smov 8   ;;  %s2909_s13 = smov 128  }
  0x47   : > { %s2910_s2 = sld [smem:[#allocation22_spill]]  ;;  %s2327_s23 = scalar_lea.vmem %s393_s30, 2048 }
  0x48   : > { %p2328_p8 = scmp.ne.s32.totalorder %s393_s30, %s2327_s23  ;;  %p2335_p12 = scmp.lt.s32.totalorder %s393_s30, %s393_s30 }
  0x49   : > { %p2336_p0 = scmp.lt.s32.totalorder %s2327_s23, %s2327_s23 }
  0x4a   : > { %p2330_p10 = pnand %p2328_p8, %p2600_p7 }
  0x4b   : > { %p2337_p13 = por %p2336_p0, %p2335_p12 }
  0x4c   : > { %p2331_p11 = pneg %p2330_p10 }
  0x4d   : > { %2016 = dma.hbm_to_vmem [thread:$0]  (!%p2594_p6), %s2910_s2, 2048, %s367_s22, [#allocation6], %s2909_s13, %s2909_s13, %s2908_s1  }
  0x4e   : > { %p2338_p2 = pnand %p2337_p13, %p2331_p11 }
  0x50   : > { %2341 = shalt.err (!%p2338_p2)
}
  0x51   : > { %s2911_s4 = sld [smem:[#allocation24_spill]]  ;;  %s2483_s1 = smov [#allocation13]  }
  0x52   : > { %s433_s22 = sshll.u32 %s2483_s1, 4  ;;  %s434_s22 = int_to_ptr.vmem [resolvable:$true] %s433_s22 }
  0x53   : > { %s2353_s13 = scalar_lea.vmem %s434_s22, 1024  ;;  %p2361_p10 = scmp.lt.s32.totalorder %s434_s22, %s434_s22 }
  0x54   : > { %p2354_p5 = scmp.ne.s32.totalorder %s434_s22, %s2353_s13  ;;  %p2362_p11 = scmp.lt.s32.totalorder %s2353_s13, %s2353_s13 }
  0x56   : > { %p2356_p9 = pnand %p2354_p5, %p2600_p7  ;;  %p2363_p12 = por %p2362_p11, %p2361_p10 }
  0x57   : > { %2022 = dma.hbm_to_vmem [thread:$0]  (!%p2594_p6), %s2911_s4, 2048, %s393_s30, [#allocation9], %s2479_s29, %s2479_s29, %s2480_s16  }
  0x58   : > { %p2357_p8 = pneg %p2356_p9 }
  0x5a   : > { %p2364_p0 = pnand %p2363_p12, %p2357_p8 }
  0x5c   : > { %2367 = shalt.err (!%p2364_p0)
}
  0x5d   : > { %s2912_s11 = sld [smem:[#allocation26_spill]]  ;;  %s1758_s18 = sadd.s32 4294967294, %s2472_s28  }
  0x5e   : > { %s2666_s21 = sadd.s32 1, %s2472_s28   ;;  %s39_s23 = sadd.s32 1, %s2468_s27 }
  0x5f   : > { %s36_s17 = ssub.s32 %s2472_s28, %s2666_s21  ;;  %p46_p13 = scmp.ne.s32.totalorder %s2468_s27, %s2464_s26 }
  0x60   : > { %p37_p7 = scmp.eq.s32.totalorder %s36_s17, 0  ;;  %p47_p2 = scmp.eq.s32.totalorder %s2472_s28, 0 }
  0x61   : > { %p52_p5 = scmp.ne.s32.totalorder %s2464_s26, %s2460_s25  ;;  %p328_p8 = scmp.eq.s32.totalorder %s2580_s14, 1 }
  0x62   : > { %s2677_s24 = scalar_select %p37_p7, %s2468_s27, %s39_s23  }
  0x63   : > { %2028 = dma.hbm_to_vmem [thread:$0]  (!%p2594_p6), %s2912_s11, 1024, %s434_s22, [#allocation12], %s2479_s29, %s2479_s29, %s2480_s16  }
  0x64   : > { %2913 = sst [smem:[#allocation20_spill]] %s2677_s24  ;;  %p2679_p9 = por %p47_p2, %p46_p13 }
  0x65   : > { %p2685_p6 = por %p2891_p1, %p52_p5  ;;  %p334_p10 = scmp.eq.s32.totalorder %s1758_s18, 1 }
  0x66   : > { %p2043_p11 = scmp.lt.s32.totalorder %s2472_s28, 2  ;;  %s450_s16 = sand.u32 1, %s2468_s27  }
  0x67   : > { %s2915_s29 = scalar_select %p2685_p6, 1, 0 }
  0x68   : > { %p2692_p12 = por %p328_p8, %p46_p13  ;;  %p2696_p0 = por %p334_p10, %p52_p5 }
  0x69   : > { %s1767_s13 = sshll.u32 %s450_s16, 3  ;;  %s1768_s20 = sshll.u32 %s2472_s28, 7 }
  0x6a   : > { %s2916_s1 = scalar_select %p2692_p12, 1, 0 }
  0x6b   : > { %s2917_s22 = scalar_select %p2696_p0, 1, 0 }
  0x6c   : > { %s2704_s23 = scalar_lea.hbm %s2874_s0, %s1768_s20  ;;  %s454_s18 = scalar_lea.vmem [#allocation2], %s1767_s13 }
  0x6d   : > { %s461_s2 = sshll.u32 %s454_s18, 4  ;;  %p2708_p7 = pnand %p2043_p11, %p2679_p9  ;;  %s462_s2 = int_to_ptr.vmem [resolvable:$true] %s461_s2 }
  0x6e   : > { %s451_s4 = scalar_lea.sflag [#allocation3], %s450_s16  ;;  %s2368_s9 = scalar_lea.hbm %s2704_s23, 128 }
  0x6f   : > { %p2369_p13 = scmp.ne.s32.totalorder %s2704_s23, %s2368_s9  ;;  %p2370_p2 = pneg %p2708_p7 }
  0x70   : > { %s2373_s17 = scalar_lea.hbm %s2874_s0, 256  ;;  %p2374_p10 = scmp.lt.s32.totalorder %s2704_s23, %s2874_s0 }
  0x71   : > { %p2371_p5 = pnand %p2370_p2, %p2369_p13  ;;  %p2375_p9 = scmp.lt.s32.totalorder %s2373_s17, %s2368_s9 }
  0x73   : > { %p2372_p8 = pneg %p2371_p5  ;;  %p2376_p11 = por %p2375_p9, %p2374_p10 }
  0x75   : > { %p2377_p4 = pnand %p2376_p11, %p2372_p8 }
  0x77   : > { %2380 = shalt.err (!%p2377_p4)
}
  0x78   : > { %s2381_s19 = scalar_lea.vmem %s462_s2, 128  ;;  %s2484_s16 = smov [#allocation2]  }
  0x79   : > { %p2382_p1 = scmp.ne.s32.totalorder %s462_s2, %s2381_s19  ;;  %s2386_s11 = sshll.u32 %s2484_s16, 4  ;;  %s2387_s11 = int_to_ptr.vmem [resolvable:$false] %s2386_s11 }
  0x7a   : > { %s2388_s24 = scalar_lea.vmem %s2387_s11, 256  ;;  %p2389_p13 = scmp.lt.s32.totalorder %s462_s2, %s2387_s11 }
  0x7b   : > { %p2384_p0 = pnand %p2382_p1, %p2370_p2  ;;  %p2390_p5 = scmp.lt.s32.totalorder %s2388_s24, %s2381_s19 }
  0x7d   : > { %p2385_p12 = pneg %p2384_p0  ;;  %p2391_p6 = por %p2390_p5, %p2389_p13 }
  0x7f   : > { %p2392_p3 = pnand %p2391_p6, %p2385_p12 }
  0x81   : > { %2395 = shalt.err (!%p2392_p3)
}
  0x82   : > { %2032 = dma.hbm_to_vmem [thread:$0]  (!%p2708_p7), %s2704_s23, 128, %s462_s2, %s451_s4  }
  0x83   : > { %p2919_p8 = scmp.ne.s32.totalorder %s2902_s15, 0 }
  0x84   : > { %s2729_s9 = sand.u32 (!%p2919_p8), 1, %s2464_s26   ;;  %p2920_p1 = scmp.ne.s32.totalorder (!%p2919_p8), %s2915_s29, 0 }
  0x85   : > { %470 = sbr.rel (%p2919_p8) target bundleno = 2516 (0x9d4), region = 72  ;;  %s1770_s20 = sshll.u32 (!%p2919_p8), %s2729_s9, 3 }
  0x86   : > { %s473_s11 = scalar_lea.sflag (!%p2919_p8), [#allocation3], %s2729_s9  ;;  %s476_s24 = scalar_lea.vmem (!%p2919_p8), [#allocation2], %s1770_s20 }
  0x8a   : > { %2439 = dma.done.wait (%p2920_p1), %s473_s11, 128  }
  0x8b   : > { %2441 = vsyncadd (%p2920_p1), %s473_s11, 4294967168  ;;  %p2921_p3 = scmp.eq.s32.totalorder %s2580_s14, 0 }
  0x8d   : > { %2443 = dma.done.wait (%p2921_p3), [#allocation6], 4096   ;;  %p2922_p4 = pmov %p2921_p3 }
  0x8e   : > { %p2923_p6 = pmov %p2921_p3 }
  0x8f   : > { %2445 = vsyncadd (%p2922_p4), [#allocation6], 4294963200 }
  0x90   : > { %2447 = dma.done.wait (%p2923_p6), [#allocation9], 4096   ;;  %p2924_p12 = pmov %p2921_p3 }
  0x91   : > { %p2925_p0 = pmov %p2921_p3 }
  0x92   : > { %2449 = vsyncadd (%p2924_p12), [#allocation9], 4294963200 }
  0x93   : > { %2451 = dma.done.wait (%p2925_p0), [#allocation12], 2048   ;;  %p2926_p7 = pmov %p2925_p0 }
  0x94   : > { %v2751_v0 = vld [vmem:[%s476_s24] sm:$0xff]  ;;  %v2102_v6 = vld [vmem:[#allocation5 + $0x64] ss:$8 sps:$4 sm:$0xff]   ;;  %v2104_v7 = vld [vmem:[#allocation5 + $0x60] ss:$8 sps:$4 sm:$0xff]   ;;  %v2485_v29 = vmov 0  }
  0x95   : > { %2453 = vsyncadd (%p2926_p7), [#allocation12], 4294965248  ;;  %547 = vadd.xlane.f32.xlu0 %v2751_v0  ;;  %v550_v1 = vmul.f32 %v2751_v0, %v2751_v0  ;;  %v2096_v2 = vld [vmem:[#allocation5 + $0x74] ss:$8 sps:$4 sm:$0xff]   ;;  %v2098_v3 = vld [vmem:[#allocation5 + $0x70] ss:$8 sps:$4 sm:$0xff]   ;;  %703 = vmatprep.mubr.bf16.mxu0 %v2485_v29 }
  0x96   : > { %671 = vmatprep.subr.bf16.mxu0 %v2096_v2  ;;  %v2099_v4 = vld [vmem:[#allocation7 + $0x74] ss:$8 sps:$4 sm:$0xff]   ;;  %v2101_v5 = vld [vmem:[#allocation7 + $0x70] ss:$8 sps:$4 sm:$0xff]   ;;  %v2105_v8 = vld [vmem:[#allocation7 + $0x64] ss:$8 sps:$4 sm:$0xff]   ;;  %840 = vmatprep.mubr.bf16.mxu1 %v2485_v29 }
  0x97   : > { %672 = vmatpush1.bf16.msra.mxu0 %v2098_v3  ;;  %808 = vmatprep.subr.bf16.mxu1 %v2099_v4  ;;  %v2107_v9 = vld [vmem:[#allocation7 + $0x60] ss:$8 sps:$4 sm:$0xff]   ;;  %v2108_v10 = vld [vmem:[#allocation5 + $0x54] ss:$8 sps:$4 sm:$0xff]   ;;  %v2110_v11 = vld [vmem:[#allocation5 + $0x50] ss:$8 sps:$4 sm:$0xff]  }
  0x98   : > { %809 = vmatpush1.bf16.msra.mxu1 %v2101_v5  ;;  %673 = vmatprep.subr.bf16.mxu0 %v2102_v6  ;;  %v2111_v12 = vld [vmem:[#allocation7 + $0x54] ss:$8 sps:$4 sm:$0xff]   ;;  %v2113_v13 = vld [vmem:[#allocation7 + $0x50] ss:$8 sps:$4 sm:$0xff]   ;;  %v2114_v14 = vld [vmem:[#allocation5 + $0x44] ss:$8 sps:$4 sm:$0xff]  }
  0x99   : > { %551 = vadd.xlane.f32.xlu0 %v550_v1  ;;  %810 = vmatprep.subr.bf16.mxu1 %v2105_v8  ;;  %v2116_v15 = vld [vmem:[#allocation5 + $0x40] ss:$8 sps:$4 sm:$0xff]   ;;  %v2117_v16 = vld [vmem:[#allocation7 + $0x44] ss:$8 sps:$4 sm:$0xff]   ;;  %v2120_v18 = vld [vmem:[#allocation5 + $0x34] ss:$8 sps:$4 sm:$0xff]  }
  0x9a   : > { %v2119_v17 = vld [vmem:[#allocation7 + $0x40] ss:$8 sps:$4 sm:$0xff]   ;;  %v2123_v19 = vld [vmem:[#allocation7 + $0x34] ss:$8 sps:$4 sm:$0xff]   ;;  %v2122_v20 = vld [vmem:[#allocation5 + $0x30] ss:$8 sps:$4 sm:$0xff]  }
  0x9b   : > { %674 = vmatpush1.bf16.msra.mxu0 %v2104_v7  ;;  %v2125_v21 = vld [vmem:[#allocation7 + $0x30] ss:$8 sps:$4 sm:$0xff]   ;;  %v2126_v22 = vld [vmem:[#allocation5 + $0x24] ss:$8 sps:$4 sm:$0xff]   ;;  %v2128_v24 = vld [vmem:[#allocation5 + $0x20] ss:$8 sps:$4 sm:$0xff]  }
  0x9c   : > { %811 = vmatpush1.bf16.msra.mxu1 %v2107_v9  ;;  %675 = vmatprep.subr.bf16.mxu0 %v2108_v10  ;;  %v2129_v23 = vld [vmem:[#allocation7 + $0x24] ss:$8 sps:$4 sm:$0xff]   ;;  %v2131_v25 = vld [vmem:[#allocation7 + $0x20] ss:$8 sps:$4 sm:$0xff]   ;;  %v2132_v26 = vld [vmem:[#allocation5 + $0x14] ss:$8 sps:$4 sm:$0xff]  }
  0x9d   : > { %812 = vmatprep.subr.bf16.mxu1 %v2111_v12  ;;  %v2135_v27 = vld [vmem:[#allocation7 + $0x14] ss:$8 sps:$4 sm:$0xff]   ;;  %v2134_v28 = vld [vmem:[#allocation5 + $0x10] ss:$8 sps:$4 sm:$0xff]   ;;  %v2138_v31 = vld [vmem:[#allocation5 + $0x4] ss:$8 sps:$4 sm:$0xff]  }
  0x9e   : > { %v2137_v30 = vld [vmem:[#allocation7 + $0x10] ss:$8 sps:$4 sm:$0xff]   ;;  %v2141_v32 = vld [vmem:[#allocation7 + $0x4] ss:$8 sps:$4 sm:$0xff]   ;;  %v2140_v33 = vld [vmem:[#allocation5] ss:$8 sps:$4 sm:$0xff]  }
  0x9f   : > { %676 = vmatpush1.bf16.msra.mxu0 %v2110_v11  ;;  %v2143_v34 = vld [vmem:[#allocation7] ss:$8 sps:$4 sm:$0xff]   ;;  %v2146_v35 = vld [vmem:[#allocation8 + $0x74] ss:$8 sps:$4 sm:$0xff]   ;;  %v1778_v45 = vld [vmem:[%s2879_s5] ss:$0 sm:$0xff] }
  0xa0   : > { %813 = vmatpush1.bf16.msra.mxu1 %v2113_v13  ;;  %677 = vmatprep.subr.bf16.mxu0 %v2114_v14  ;;  %v1779_v47 = vld [vmem:[%s2880_s6] ss:$0 sm:$0xff]  ;;  %v2149_v52 = vld [vmem:[#allocation8 + $0x64] ss:$8 sps:$4 sm:$0xff]   ;;  %v2147_v53 = vld [vmem:[#allocation8 + $0x60] ss:$8 sps:$4 sm:$0xff]  }
  0xa1   : > { %814 = vmatprep.subr.bf16.mxu1 %v2117_v16  ;;  %v2144_v50 = vld [vmem:[#allocation8 + $0x70] ss:$8 sps:$4 sm:$0xff]   ;;  %v2152_v54 = vld [vmem:[#allocation8 + $0x54] ss:$8 sps:$4 sm:$0xff]   ;;  %v2155_v56 = vld [vmem:[#allocation8 + $0x44] ss:$8 sps:$4 sm:$0xff]  }
  0xa2   : > { %v2150_v55 = vld [vmem:[#allocation8 + $0x50] ss:$8 sps:$4 sm:$0xff]   ;;  %v2153_v57 = vld [vmem:[#allocation8 + $0x40] ss:$8 sps:$4 sm:$0xff]   ;;  %v2158_v58 = vld [vmem:[#allocation8 + $0x34] ss:$8 sps:$4 sm:$0xff]  }
  0xa3   : > { %678 = vmatpush1.bf16.msra.mxu0 %v2116_v15  ;;  %v2156_v59 = vld [vmem:[#allocation8 + $0x30] ss:$8 sps:$4 sm:$0xff]   ;;  %v2161_v60 = vld [vmem:[#allocation8 + $0x24] ss:$8 sps:$4 sm:$0xff]   ;;  %v2159_v61 = vld [vmem:[#allocation8 + $0x20] ss:$8 sps:$4 sm:$0xff]  }
  0xa4   : > { %815 = vmatpush1.bf16.msra.mxu1 %v2119_v17  ;;  %679 = vmatprep.subr.bf16.mxu0 %v2120_v18  ;;  %v2164_v62 = vld [vmem:[#allocation8 + $0x14] ss:$8 sps:$4 sm:$0xff]   ;;  %v2162_v63 = vld [vmem:[#allocation8 + $0x10] ss:$8 sps:$4 sm:$0xff]   ;;  %v2167_v1 = vld [vmem:[#allocation8 + $0x4] ss:$8 sps:$4 sm:$0xff]  }
  0xa5   : > { %816 = vmatprep.subr.bf16.mxu1 %v2123_v19  ;;  %v2165_v2 = vld [vmem:[#allocation8] ss:$8 sps:$4 sm:$0xff]   ;;  %v2486_v3 = vmov 0.0   ;;  %vm2487_vm0 = vmmov 0   ;;  %vm1045_vm1 = vcmask 1043456   ;;  %vm1029_vm2 = vcmask 64512  }
  0xa6   : > { %s1867_s11 = sshll.u32 %s2580_s14, 7  ;;  %s542_s24 = scalar_lea.vmem [#allocation14], %s1770_s20 }
  0xa7   : > { %680 = vmatpush1.bf16.msra.mxu0 %v2122_v20  ;;  %s1631_s2 = sshll.u32 %s542_s24, 4  ;;  %s2927_s15 = sld [smem:[#allocation27_spill]]  ;;  %s2833_s2 = int_to_ptr.vmem [resolvable:$true] %s1631_s2 }
  0xa8   : > { %817 = vmatpush1.bf16.msra.mxu1 %v2125_v21  ;;  %681 = vmatprep.subr.bf16.mxu0 %v2126_v22  ;;  %s1618_s14 = scalar_lea.sflag [#allocation4], %s2729_s9  ;;  %s2396_s20 = scalar_lea.vmem %s2833_s2, 128 }
  0xa9   : > { %818 = vmatprep.subr.bf16.mxu1 %v2129_v23  ;;  %p2397_p2 = scmp.ne.s32.totalorder %s2833_s2, %s2396_s20  ;;  %p2928_p10 = scmp.ne.s32.totalorder %s2916_s1, 0 }
  0xaa   : > { %s2488_s23 = smov [#allocation14]  }
  0xab   : > { %682 = vmatpush1.bf16.msra.mxu0 %v2128_v24  ;;  %p2398_p9 = pnand %p2397_p2, %p2928_p10  ;;  %s2400_s30 = sshll.u32 %s2488_s23, 4  ;;  %s2401_s30 = int_to_ptr.vmem [resolvable:$false] %s2400_s30 }
  0xac   : > { %819 = vmatpush1.bf16.msra.mxu1 %v2131_v25  ;;  %683 = vmatprep.subr.bf16.mxu0 %v2132_v26  ;;  %s2402_s17 = scalar_lea.vmem %s2401_s30, 256  ;;  %p2403_p13 = scmp.lt.s32.totalorder %s2833_s2, %s2401_s30 }
  0xad   : > { %820 = vmatprep.subr.bf16.mxu1 %v2135_v27  ;;  %s2831_s29 = scalar_lea.hbm %s2927_s15, %s1867_s11  ;;  %p2399_p11 = pneg %p2398_p9 }
  0xae   : > { %p2404_p5 = scmp.lt.s32.totalorder %s2402_s17, %s2396_s20 }
  0xaf   : > { %684 = vmatpush1.bf16.msra.mxu0 %v2134_v28 }
  0xb0   : > { %821 = vmatpush1.bf16.msra.mxu1 %v2137_v30  ;;  %685 = vmatprep.subr.bf16.mxu0 %v2138_v31  ;;  %p2405_p8 = por %p2404_p5, %p2403_p13 }
  0xb1   : > { %822 = vmatprep.subr.bf16.mxu1 %v2141_v32 }
  0xb2   : > { %p2406_p1 = pnand %p2405_p8, %p2399_p11 }
  0xb3   : > { %686 = vmatpush1.bf16.msra.mxu0 %v2140_v33 }
  0xb4   : > { %823 = vmatpush1.bf16.msra.mxu1 %v2143_v34  ;;  %945 = vmatprep.subr.bf16.mxu0 %v2146_v35 }
  0xb5   : > { %1918 = vmatprep.subr.bf16.mxu1 %v2486_v3 }
 0x11e   : > { %v548_v36 = vpop.xlane.xlu0 %547 }
 0x11f   : > { %v549_v37 = vmul.f32 0.1, %v548_v36 }
 0x121   : > { %v554_v39 = vmul.f32 %v549_v37, %v549_v37  ;;  %v556_v43 = vsub.f32 %v2751_v0, %v549_v37 }
 0x122   : > { %v552_v38 = vpop.xlane.xlu0 %551 }
 0x123   : > { %v553_v40 = vmul.f32 0.1, %v552_v38 }
 0x125   : > { %v555_v41 = vsub.f32 %v553_v40, %v554_v39 }
 0x127   : > { %v557_v42 = vadd.f32 1e-05, %v555_v41 }
 0x129   : > { %2200 = vrsqrt.f32 %v557_v42 }
 0x136   : > { %v2201_v44 = vpop.eup %2200 }
 0x137   : > { %v559_v46 = vmul.f32 %v2201_v44, %v556_v43 }
 0x139   : > { %v566_v48 = vmul.f32 %v1778_v45, %v559_v46 }
 0x13b   : > { %v573_v49 = vadd.f32 %v1779_v47, %v566_v48 }
 0x13d   : > { %v574_v51 = vpack.c.bf16 %v573_v49, %v573_v49 }
 0x13f   : > { %704 = vmatmul.mubr.bf16.vlgmr.msra.gmra.mxu0 %v574_v51  ;;  %841 = vmatmul.mubr.bf16.vlgmr.msra.gmra.mxu1 %v574_v51 }
 0x140   : > { %946 = vmatpush1.bf16.msra.mxu0 %v2144_v50  ;;  %977 = vmatprep.mubr.bf16.mxu0 %v2485_v29 }
 0x141   : > { %947 = vmatprep.subr.bf16.mxu0 %v2149_v52  ;;  %1920 = vmatprep.mubr.msk.bf16.mxu1 %vm2487_vm0, %v2486_v3  ;;  %v2168_v52 = vld [vmem:[#allocation10 + $0x78] sm:$0xff]  }
 0x144   : > { %948 = vmatpush1.bf16.msra.mxu0 %v2147_v53  ;;  %v2169_v53 = vld [vmem:[#allocation10 + $0x38] sm:$0xff]  }
 0x145   : > { %949 = vmatprep.subr.bf16.mxu0 %v2152_v54  ;;  %v2170_v54 = vld [vmem:[#allocation10 + $0x70] sm:$0xff]  }
 0x148   : > { %950 = vmatpush1.bf16.msra.mxu0 %v2150_v55  ;;  %v2171_v55 = vld [vmem:[#allocation10 + $0x30] sm:$0xff]  }
 0x149   : > { %951 = vmatprep.subr.bf16.mxu0 %v2155_v56  ;;  %v2172_v56 = vld [vmem:[#allocation10 + $0x68] sm:$0xff]  }
 0x14c   : > { %952 = vmatpush1.bf16.msra.mxu0 %v2153_v57  ;;  %v2173_v57 = vld [vmem:[#allocation10 + $0x28] sm:$0xff]  }
 0x14d   : > { %953 = vmatprep.subr.bf16.mxu0 %v2158_v58  ;;  %v2174_v58 = vld [vmem:[#allocation10 + $0x60] sm:$0xff]  }
 0x150   : > { %954 = vmatpush1.bf16.msra.mxu0 %v2156_v59  ;;  %v2175_v59 = vld [vmem:[#allocation10 + $0x20] sm:$0xff]  }
 0x151   : > { %955 = vmatprep.subr.bf16.mxu0 %v2161_v60  ;;  %v2176_v60 = vld [vmem:[#allocation10 + $0x58] sm:$0xff]  }
 0x154   : > { %956 = vmatpush1.bf16.msra.mxu0 %v2159_v61  ;;  %v2177_v61 = vld [vmem:[#allocation10 + $0x18] sm:$0xff]  }
 0x155   : > { %957 = vmatprep.subr.bf16.mxu0 %v2164_v62  ;;  %v2178_v62 = vld [vmem:[#allocation10 + $0x50] sm:$0xff]  }
 0x158   : > { %958 = vmatpush1.bf16.msra.mxu0 %v2162_v63  ;;  %v2179_v63 = vld [vmem:[#allocation10 + $0x10] sm:$0xff]  }
 0x159   : > { %959 = vmatprep.subr.bf16.mxu0 %v2167_v1  ;;  %v2180_v1 = vld [vmem:[#allocation10 + $0x48] sm:$0xff]  }
 0x15c   : > { %960 = vmatpush1.bf16.msra.mxu0 %v2165_v2  ;;  %v2181_v2 = vld [vmem:[#allocation10 + $0x8] sm:$0xff]  }
 0x15d   : > { %1878 = vmatprep.subr.bf16.mxu0 %v2168_v52  ;;  %v2199_v52 = vld [vmem:[#allocation13] sm:$0xff]  }
 0x15f   : > { %978 = vmatmul.mubr.bf16.vlgmr.msra.gmra.mxu0 %v574_v51 }
 0x160   : > { %1879 = vmatpush3.bf16.msra.mxu0 %v2169_v53  ;;  %v1848_v53 = vld [vmem:[%s2884_s10] ss:$0 sm:$0xff] }
 0x161   : > { %1880 = vmatprep.subr.bf16.mxu0 %v2170_v54 }
 0x164   : > { %1881 = vmatpush3.bf16.msra.mxu0 %v2171_v55 }
 0x165   : > { %1882 = vmatprep.subr.bf16.mxu0 %v2172_v56 }
 0x168   : > { %1883 = vmatpush3.bf16.msra.mxu0 %v2173_v57 }
 0x169   : > { %1884 = vmatprep.subr.bf16.mxu0 %v2174_v58 }
 0x16c   : > { %1885 = vmatpush3.bf16.msra.mxu0 %v2175_v59 }
 0x16d   : > { %1886 = vmatprep.subr.bf16.mxu0 %v2176_v60 }
 0x170   : > { %1887 = vmatpush3.bf16.msra.mxu0 %v2177_v61  ;;  %v1857_v61 = vld [vmem:[%s2886_s12] ss:$0 sm:$0xff] }
 0x171   : > { %1888 = vmatprep.subr.bf16.mxu0 %v2178_v62 }
 0x174   : > { %1889 = vmatpush3.bf16.msra.mxu0 %v2179_v63 }
 0x175   : > { %1890 = vmatprep.subr.bf16.mxu0 %v2180_v1 }
 0x178   : > { %1891 = vmatpush3.bf16.msra.mxu0 %v2181_v2 }
 0x1ff   : > { %v705_v4 = vpop.f32.mrf.mxu0  ;;  %v842_v5 = vpop.f32.mrf.mxu1 }
 0x200   : > { %v987_v6 = vpack.c.bf16 %v842_v5, %v842_v5  ;;  %v986_v13 = vpack.c.bf16 %v705_v4, %v705_v4 }
 0x201   : > { %v707_v7 = vpop.f32.mrf.mxu0  ;;  %v844_v8 = vpop.f32.mrf.mxu1 }
 0x202   : > { %1919 = vmatpush3.bf16.xpose.msra.mxu1 %v987_v6  ;;  %v1090_v36 = vpack.c.bf16 %v844_v8, %v844_v8  ;;  %v1089_v37 = vpack.c.bf16 %v707_v7, %v707_v7  ;;  %v2182_v8 = vld [vmem:[#allocation10 + $0x40] sm:$0xff]  }
 0x203   : > { %v709_v9 = vpop.f32.mrf.mxu0  ;;  %v846_v10 = vpop.f32.mrf.mxu1  ;;  %1924 = vmatprep.subr.bf16.mxu1 %v2486_v3  ;;  %1892 = vmatprep.subr.bf16.mxu0 %v2182_v8 }
 0x204   : > { %v2183_v9 = vld [vmem:[#allocation10] sm:$0xff]  }
 0x205   : > { %v710_v11 = vpop.f32.mrf.mxu0  ;;  %v847_v12 = vpop.f32.mrf.mxu1  ;;  %1893 = vmatpush3.bf16.msra.mxu0 %v2183_v9 }
 0x206   : > { %1962 = vmatprep.subr.bf16.mxu0 %v2486_v3 }
 0x209   : > { %1921 = vmatmul.mubr.bf16.vlgmr.msra.gmra.mxu1 %v986_v13 }
 0x20a   : > { %1926 = vmatprep.mubr.msk.bf16.mxu1 %vm2487_vm0, %v2486_v3 }
 0x21f   : > { %v979_v14 = vpop.f32.mrf.mxu0 }
 0x220   : > { %v988_v15 = vpack.c.bf16 %v979_v14, %v979_v14 }
 0x221   : > { %v981_v16 = vpop.f32.mrf.mxu0 }
 0x222   : > { %v1047_v17 = vsel %vm1045_vm1, %v988_v15, 0  ;;  %v1091_v18 = vpack.c.bf16 %v981_v16, %v981_v16  ;;  %v2184_v16 = vld [vmem:[#allocation11 + $0x38] sm:$0xff]  }
 0x223   : > { %v983_v19 = vpop.f32.mrf.mxu0  ;;  %1925 = vmatpush3.bf16.msra.mxu1 %v1047_v17 }
 0x224   : > { %v1148_v20 = vsel %vm1045_vm1, %v1091_v18, 0  ;;  %1930 = vmatprep.subr.bf16.mxu1 %v2486_v3 }
 0x225   : > { %v984_v21 = vpop.f32.mrf.mxu0 }
 0x2c9   : > { %v1023_v22 = vpop.f32.mrf.mxu1 }
 0x2ca   : > { %v1030_v23 = vsel %vm1029_vm2, %v1023_v22, -inf }
 0x2cb   : > { %1031 = vmax.xlane.f32.xlu1 %v1030_v23  ;;  %v1922_v24 = vpop.f32.mrf.mxu1 }
 0x2cc   : > { %v2185_v24 = vld [vmem:[#allocation11 + $0x30] sm:$0xff]  }
 0x2cd   : > { %v1026_v25 = vpop.f32.mrf.mxu1 }
 0x2ce   : > { %v2186_v25 = vld [vmem:[#allocation11 + $0x28] sm:$0xff]  }
 0x2cf   : > { %v1923_v26 = vpop.f32.mrf.mxu1 }
 0x2d0   : > { %v2187_v26 = vld [vmem:[#allocation11 + $0x20] sm:$0xff]  }
 0x354   : > { %v1032_v27 = vpop.xlane.xlu1 %1031 }
 0x355   : > { %v1033_v28 = vsub.f32 %v1023_v22, %v1032_v27  ;;  %v2188_v27 = vld [vmem:[#allocation11 + $0x18] sm:$0xff]  }
 0x357   : > { %v1034_v29 = vmul.f32 1.442695, %v1033_v28  ;;  %v2190_v28 = vld [vmem:[#allocation11 + $0x8] sm:$0xff]  }
 0x359   : > { %2202 = vpow2.f32 %v1034_v29  ;;  %v2191_v29 = vld [vmem:[#allocation11] sm:$0xff]  }
 0x366   : > { %v2203_v30 = vpop.eup %2202 }
 0x367   : > { %v1036_v31 = vsel %vm1029_vm2, %v2203_v30, 0.0 }
 0x368   : > { %1037 = vadd.xlane.f32.xlu1 %v1036_v31  ;;  %v2193_v31 = vld [vmem:[#allocation13 + $0x30] sm:$0xff]  }
 0x3f1   : > { %v1038_v32 = vpop.xlane.xlu1 %1037 }
 0x3f2   : > { %2204 = vrcp.f32 %v1038_v32  ;;  %v2194_v32 = vld [vmem:[#allocation13 + $0x28] sm:$0xff]  }
 0x3ff   : > { %v2205_v33 = vpop.eup %2204 }
 0x400   : > { %v1040_v34 = vmul.f32 %v2205_v33, %v2203_v30  ;;  %v2192_v30 = vld [vmem:[#allocation13 + $0x38] sm:$0xff]   ;;  %v2195_v33 = vld [vmem:[#allocation13 + $0x20] sm:$0xff]  }
 0x402   : > { %v1041_v35 = vpack.c.bf16 %v1040_v34, %v1040_v34  ;;  %v2196_v34 = vld [vmem:[#allocation13 + $0x18] sm:$0xff]  }
 0x404   : > { %1927 = vmatmul.mubr.msk.bf16.vlgmr.msra.gmra.mxu1 %vm1029_vm2, %v1041_v35  ;;  %v2197_v35 = vld [vmem:[#allocation13 + $0x10] sm:$0xff]  }
 0x405   : > { %1931 = vmatpush3.bf16.xpose.msra.mxu1 %v1090_v36  ;;  %1932 = vmatprep.mubr.msk.bf16.mxu1 %vm2487_vm0, %v2486_v3 }
 0x406   : > { %1936 = vmatprep.subr.bf16.mxu1 %v2486_v3 }
 0x40c   : > { %1933 = vmatmul.mubr.bf16.vlgmr.msra.gmra.mxu1 %v1089_v37 }
 0x40d   : > { %1937 = vmatpush3.bf16.msra.mxu1 %v1148_v20  ;;  %1938 = vmatprep.mubr.msk.bf16.mxu1 %vm2487_vm0, %v2486_v3 }
 0x40e   : > { %1942 = vmatprep.subr.bf16.mxu1 %v2486_v3 }
 0x4c4   : > { %v2779_v38 = vpop.f32.mrf.mxu1 }
 0x4c5   : > { %v1190_v12 = vpack.c.bf16 %v2779_v38, %v2779_v38 }
 0x4c6   : > { %v1928_v39 = vpop.f32.mrf.mxu1 }
 0x4c8   : > { %v1086_v40 = vpop.f32.mrf.mxu1 }
 0x4ca   : > { %v1929_v41 = vpop.f32.mrf.mxu1 }
 0x4cc   : > { %v1126_v42 = vpop.f32.mrf.mxu1 }
 0x4cd   : > { %v1132_v43 = vsel %vm1029_vm2, %v1126_v42, -inf }
 0x4ce   : > { %1133 = vmax.xlane.f32.xlu0 %v1132_v43  ;;  %v1934_v44 = vpop.f32.mrf.mxu1 }
 0x4d0   : > { %v1129_v45 = vpop.f32.mrf.mxu1 }
 0x4d1   : > { %v1846_v45 = vld [vmem:[%s2881_s7] ss:$0 sm:$0xff] }
 0x4d2   : > { %v1935_v46 = vpop.f32.mrf.mxu1 }
 0x557   : > { %v1134_v47 = vpop.xlane.xlu0 %1133 }
 0x558   : > { %v1135_v48 = vsub.f32 %v1126_v42, %v1134_v47  ;;  %v1847_v47 = vld [vmem:[%s2882_s8] ss:$0 sm:$0xff] }
 0x55a   : > { %v1136_v49 = vmul.f32 1.442695, %v1135_v48 }
 0x55c   : > { %2206 = vpow2.f32 %v1136_v49 }
 0x569   : > { %v2207_v50 = vpop.eup %2206 }
 0x56a   : > { %v1138_v51 = vsel %vm1029_vm2, %v2207_v50, 0.0 }
 0x56b   : > { %1139 = vadd.xlane.f32.xlu1 %v1138_v51  ;;  %v2198_v51 = vld [vmem:[#allocation13 + $0x8] sm:$0xff]  }
 0x5f4   : > { %v1140_v4 = vpop.xlane.xlu1 %1139 }
 0x5f5   : > { %2208 = vrcp.f32 %v1140_v4 }
 0x602   : > { %v2209_v5 = vpop.eup %2208 }
 0x603   : > { %v1142_v6 = vmul.f32 %v2209_v5, %v2207_v50 }
 0x605   : > { %v1143_v7 = vpack.c.bf16 %v1142_v6, %v1142_v6 }
 0x607   : > { %1939 = vmatmul.mubr.msk.bf16.vlgmr.msra.gmra.mxu1 %vm1029_vm2, %v1143_v7 }
 0x608   : > { %1958 = vmatprep.mubr.msk.bf16.mxu1 %vm2487_vm0, %v2486_v3  ;;  %1943 = vmatpush3.bf16.msra.mxu1 %v2184_v16 }
 0x609   : > { %1944 = vmatprep.subr.bf16.mxu1 %v2486_v3 }
 0x60c   : > { %1945 = vmatpush3.bf16.msra.mxu1 %v2185_v24 }
 0x60d   : > { %1946 = vmatprep.subr.bf16.mxu1 %v2486_v3 }
 0x610   : > { %1947 = vmatpush3.bf16.msra.mxu1 %v2186_v25 }
 0x611   : > { %1948 = vmatprep.subr.bf16.mxu1 %v2486_v3 }
 0x614   : > { %1949 = vmatpush3.bf16.msra.mxu1 %v2187_v26 }
 0x615   : > { %1950 = vmatprep.subr.bf16.mxu1 %v2486_v3 }
 0x618   : > { %1951 = vmatpush3.bf16.msra.mxu1 %v2188_v27 }
 0x619   : > { %1952 = vmatprep.subr.bf16.mxu1 %v2486_v3 }
 0x6c7   : > { %v1184_v10 = vpop.f32.mrf.mxu1 }
 0x6c8   : > { %v1191_v11 = vpack.c.bf16 %v1184_v10, %v1184_v10 }
 0x6c9   : > { %v1940_v13 = vpop.f32.mrf.mxu1 }
 0x6ca   : > { %1352 = vmatprep.mubr.bf16.mxu0 %v1191_v11 }
 0x6cb   : > { %v1187_v14 = vpop.f32.mrf.mxu1  ;;  %1353 = vmatmul.mubr.bf16.vlgmr.msra.gmra.mxu0 %v1190_v12 }
 0x6cc   : > { %1978 = vmatprep.mubr.msk.bf16.mxu0 %vm2487_vm0, %v2486_v3  ;;  %1963 = vmatpush3.bf16.msra.mxu0 %v2192_v30 }
 0x6cd   : > { %v1941_v15 = vpop.f32.mrf.mxu1  ;;  %1964 = vmatprep.subr.bf16.mxu0 %v2486_v3 }
 0x6d0   : > { %1965 = vmatpush3.bf16.msra.mxu0 %v2193_v31 }
 0x6d1   : > { %1966 = vmatprep.subr.bf16.mxu0 %v2486_v3 }
 0x6d4   : > { %1967 = vmatpush3.bf16.msra.mxu0 %v2194_v32 }
 0x6d5   : > { %1968 = vmatprep.subr.bf16.mxu0 %v2486_v3 }
 0x6d8   : > { %1969 = vmatpush3.bf16.msra.mxu0 %v2195_v33 }
 0x6d9   : > { %1970 = vmatprep.subr.bf16.mxu0 %v2486_v3 }
 0x6dc   : > { %1971 = vmatpush3.bf16.msra.mxu0 %v2196_v34 }
 0x6dd   : > { %1972 = vmatprep.subr.bf16.mxu0 %v2486_v3 }
 0x6e0   : > { %1973 = vmatpush3.bf16.msra.mxu0 %v2197_v35 }
 0x6e1   : > { %1974 = vmatprep.subr.bf16.mxu0 %v2486_v3 }
 0x6e4   : > { %1975 = vmatpush3.bf16.msra.mxu0 %v2198_v51 }
 0x6e5   : > { %1976 = vmatprep.subr.bf16.mxu0 %v2486_v3 }
 0x6e8   : > { %1977 = vmatpush3.bf16.msra.mxu0 %v2199_v52 }
 0x78b   : > { %v1894_v17 = vpop.f32.mrf.mxu0 }
 0x78d   : > { %v1895_v18 = vpop.f32.mrf.mxu0 }
 0x78e   : > { %v1896_v19 = vadd.f32 %v1895_v18, %v1894_v17 }
 0x78f   : > { %v1897_v20 = vpop.f32.mrf.mxu0 }
 0x790   : > { %v2793_v21 = vadd.f32 %v1896_v19, %v2751_v0  ;;  %v2189_v0 = vld [vmem:[#allocation11 + $0x10] sm:$0xff]  }
 0x791   : > { %v1898_v22 = vpop.f32.mrf.mxu0  ;;  %1953 = vmatpush3.bf16.msra.mxu1 %v2189_v0 }
 0x792   : > { %1363 = vadd.xlane.f32.xlu0 %v2793_v21  ;;  %v1366_v23 = vmul.f32 %v2793_v21, %v2793_v21  ;;  %1954 = vmatprep.subr.bf16.mxu1 %v2486_v3 }
 0x794   : > { %1367 = vadd.xlane.f32.xlu1 %v1366_v23 }
 0x795   : > { %1955 = vmatpush3.bf16.msra.mxu1 %v2190_v28 }
 0x796   : > { %1956 = vmatprep.subr.bf16.mxu1 %v2486_v3 }
 0x799   : > { %1957 = vmatpush3.bf16.msra.mxu1 %v2191_v29 }
 0x81b   : > { %v1364_v36 = vpop.xlane.xlu0 %1363 }
 0x81c   : > { %v1365_v37 = vmul.f32 0.1, %v1364_v36 }
 0x81d   : > { %v1368_v38 = vpop.xlane.xlu1 %1367 }
 0x81e   : > { %v1370_v39 = vmul.f32 %v1365_v37, %v1365_v37  ;;  %v1369_v40 = vmul.f32 0.1, %v1368_v38  ;;  %v1372_v43 = vsub.f32 %v2793_v21, %v1365_v37 }
 0x820   : > { %v1371_v41 = vsub.f32 %v1369_v40, %v1370_v39 }
 0x822   : > { %v1373_v42 = vadd.f32 1e-05, %v1371_v41 }
 0x824   : > { %2210 = vrsqrt.f32 %v1373_v42 }
 0x831   : > { %v2211_v44 = vpop.eup %2210 }
 0x832   : > { %v1375_v46 = vmul.f32 %v2211_v44, %v1372_v43 }
 0x834   : > { %v1382_v48 = vmul.f32 %v1846_v45, %v1375_v46 }
 0x836   : > { %v1389_v49 = vadd.f32 %v1847_v47, %v1382_v48 }
 0x838   : > { %v1390_v50 = vpack.c.bf16 %v1389_v49, %v1389_v49 }
 0x83a   : > { %1959 = vmatmul.mubr.bf16.vlgmr.msra.gmra.mxu1 %v1390_v50 }
 0x8fa   : > { %v1496_v54 = vpop.f32.mrf.mxu1 }
 0x8fb   : > { %v1497_v55 = vadd.f32 %v1848_v53, %v1496_v54 }
 0x8fc   : > { %v1960_v56 = vpop.f32.mrf.mxu1 }
 0x8fd   : > { %v1502_v57 = vmax.f32 %v1497_v55, 0.0 }
 0x8fe   : > { %v1499_v58 = vpop.f32.mrf.mxu1 }
 0x8ff   : > { %v1503_v59 = vpack.c.bf16 %v1502_v57, %v1502_v57 }
 0x900   : > { %v1961_v60 = vpop.f32.mrf.mxu1 }
 0x901   : > { %1979 = vmatmul.mubr.bf16.vlgmr.msra.gmra.mxu0 %v1503_v59 }
 0x9c1   : > { %v1609_v3 = vpop.f32.mrf.mxu0 }
 0x9c2   : > { %v1610_v62 = vadd.f32 %v1857_v61, %v1609_v3 }
 0x9c3   : > { %v1980_v63 = vpop.f32.mrf.mxu0 }
 0x9c4   : > { %v1615_v1 = vadd.f32 %v1610_v62, %v2793_v21 }
 0x9c5   : > { %v1612_v2 = vpop.f32.mrf.mxu0 }
 0x9c6   : > { %1616 = vst [vmem:[%s542_s24] sm:$0xff] %v1615_v1 }
 0x9c7   : > { %v1981_v4 = vpop.f32.mrf.mxu0 }
 0x9c8   : > { %2409 = shalt.err (!%p2406_p1)
}
 0x9c9   : > { %s2410_s13 = scalar_lea.hbm %s2831_s29, 128  ;;  %s2414_s19 = scalar_lea.hbm %s2927_s15, 256 }
 0x9ca   : > { %p2411_p3 = scmp.ne.s32.totalorder %s2831_s29, %s2410_s13  ;;  %p2415_p12 = scmp.lt.s32.totalorder %s2831_s29, %s2927_s15 }
 0x9cb   : > { %p2416_p0 = scmp.lt.s32.totalorder %s2414_s19, %s2410_s13 }
 0x9cc   : > { %p2412_p4 = pnand %p2411_p3, %p2928_p10 }
 0x9cd   : > { %p2417_p7 = por %p2416_p0, %p2415_p12 }
 0x9ce   : > { %p2413_p6 = pneg %p2412_p4 }
 0x9d0   : > { %p2418_p2 = pnand %p2417_p7, %p2413_p6 }
 0x9d2   : > { %2421 = shalt.err (!%p2418_p2)
}
 0x9d3   : > { %2008 = dma.vmem_to_hbm [thread:$0]  (%p2928_p10), %s2833_s2, 128, %s2831_s29, %s1618_s14  }
 0x9d4 PF: > { %s1643_s24 = sand.u32 1, %s2460_s25   ;;  %p2929_p9 = scmp.ne.s32.totalorder %s2917_s22, 0 }
 0x9d5   : > { %p2930_p11 = scmp.ge.s32.totalorder %s2472_s28, 2  ;;  %s1644_s3 = scalar_lea.sflag [#allocation4], %s1643_s24 }
 0x9d7   : > { %p2034_p13 = pnand %p2930_p11, %p2929_p9 }
 0x9d9   : > { %p2035_p5 = pneg %p2034_p13 }
 0x9db   : > { %2455 = dma.done.wait (%p2035_p5), %s1644_s3, 128  }
 0x9dc   : > { %2457 = vsyncadd (%p2035_p5), %s1644_s3, 4294967168  ;;  %s2931_s4 = sld [smem:[#allocation20_spill]]  ;;  %p29_p8 = scmp.ge.s32.totalorder %s2666_s21, 4  }
 0x9dd   : > { %s2932_s25 = smov %s2464_s26  ;;  %s2933_s26 = smov %s2468_s27 }
 0x9de   : > { %s2935_s28 = smov %s2666_s21  ;;  %31 = sbr.rel (!%p29_p8) target bundleno = 16 (0x10), region = 141 }
 0x9e2   : > { %s2934_s27 = smov %s2931_s4 }
 0x9e3   :  { %1649 = vsyncpa [#allocation3], 1 }
 0x9e4   :  { %1651 = vsyncpa [#allocation3 + $0x1], 1 }
 0x9e5   :  { %1652 = vsyncpa [#allocation6], 1 }
 0x9e6   :  { %1653 = vsyncpa [#allocation9], 1 }
 0x9e7   :  { %1654 = vsyncpa [#allocation12], 1 }
 0x9e8   :  { %1655 = vsyncpa [#allocation4], 1 }
 0x9e9   :  { %1657 = vsyncpa [#allocation4 + $0x1], 1 }

</bundles_post_ra>
